<compile_context>
chip_gen: v7x
topology: tpu7x:2x2x1
jax: 0.10.0
libtpu: 0.0.40
codegen_flags: <defaults>
</compile_context>

<pallas_src>
import jax
import jax.numpy as jnp
from jax import lax
from jax.experimental import pallas as pl
from jax.experimental.pallas import tpu as pltpu

LANE = 128
VMEM_LIMIT_BYTES = 48 * 1024 * 1024   # fits v5e/v6e (128 MiB) and v7x (64 MiB) VMEM


def _round_up(x, m):
    return ((x + m - 1) // m) * m


def _row_tile(h, w, target_rows):
    """Output rows per grid step: th * w ~= target_rows, th divides h."""
    th = max(1, min(h, max(1, target_rows // max(w, 1))))
    while h % th:
        th -= 1
    return th


# ------------------------------ Pallas kernels ------------------------------

def _make_conv_relu_kernel(th, width, cp_out):
    """3x3 'same' conv + bias + ReLU for one (th x width) row block of one image.

    x_ref : (1, H+2, W+2, cp_in)   bf16 (full halo-padded image, stays resident per b)
    w_ref : (3, 3, cp_in, cp_out)  bf16
    b_ref : (1, cp_out)            f32
    o_ref : (1, th, width, cp_out) bf16
    """
    def kernel(x_ref, w_ref, b_ref, o_ref):
        r = pl.program_id(1)
        h0 = r * th
        xb = x_ref[0, pl.ds(h0, th + 2), :, :]              # (th+2, W+2, cp_in) bf16
        acc = jnp.zeros((th * width, cp_out), jnp.float32)
        for kh in range(3):                                  # 9 shifted-tap matmuls
            for kw in range(3):
                xs = xb[kh:kh + th, kw:kw + width, :]        # (th, W, cp_in)
                xs = xs.reshape(th * width, xs.shape[-1])
                acc = acc + jnp.dot(xs, w_ref[kh, kw],
                                    preferred_element_type=jnp.float32)
        y = jnp.maximum(acc + b_ref[...], 0.0)               # f32 epilogue
        o_ref[0] = y.reshape(th, width, cp_out).astype(o_ref.dtype)
    return kernel


def _make_conv_relu_gap_kernel(th, width, cp_out, inv_hw):
    """Same conv as above, fused with global average pooling: the (1,1,cp_out) output
    block is revisited across the row-grid axis, accumulates the sum of post-ReLU
    activations, and is normalized by 1/(H*W) on the last row step."""
    def kernel(x_ref, w_ref, b_ref, o_ref):
        r = pl.program_id(1)

        @pl.when(r == 0)
        def _init():
            o_ref[...] = jnp.zeros_like(o_ref)

        h0 = r * th
        xb = x_ref[0, pl.ds(h0, th + 2), :, :]
        acc = jnp.zeros((th * width, cp_out), jnp.float32)
        for kh in range(3):
            for kw in range(3):
                xs = xb[kh:kh + th, kw:kw + width, :]
                xs = xs.reshape(th * width, xs.shape[-1])
                acc = acc + jnp.dot(xs, w_ref[kh, kw],
                                    preferred_element_type=jnp.float32)
        y = jnp.maximum(acc + b_ref[...], 0.0)               # (th*W, cp_out) f32
        o_ref[0] += jnp.sum(y, axis=0, keepdims=True)

        @pl.when(r == pl.num_programs(1) - 1)
        def _finalize():
            o_ref[...] = o_ref[...] * inv_hw
    return kernel


# ------------------------------ layer wrappers -------------------------------

def _conv_call(x_halo, w_p, b_p, th, fuse_gap):
    """x_halo: (B, H+2, W+2, cp_in) bf16, spatially zero-padded, channels lane-padded."""
    bsz, hp2, wp2, cp_in = x_halo.shape
    h, w = hp2 - 2, wp2 - 2
    cp_out = w_p.shape[-1]
    grid = (bsz, h // th)

    in_specs = [
        pl.BlockSpec((1, hp2, wp2, cp_in), lambda b, r: (b, 0, 0, 0)),
        pl.BlockSpec((3, 3, cp_in, cp_out), lambda b, r: (0, 0, 0, 0)),
        pl.BlockSpec((1, cp_out), lambda b, r: (0, 0)),
    ]
    if fuse_gap:
        kernel = _make_conv_relu_gap_kernel(th, w, cp_out, 1.0 / float(h * w))
        out_shape = jax.ShapeDtypeStruct((bsz, 1, cp_out), jnp.float32)
        out_specs = pl.BlockSpec((1, 1, cp_out), lambda b, r: (b, 0, 0))
        semantics = ("parallel", "arbitrary")      # row axis is a reduction (GAP)
    else:
        kernel = _make_conv_relu_kernel(th, w, cp_out)
        out_shape = jax.ShapeDtypeStruct((bsz, h, w, cp_out), jnp.bfloat16)
        out_specs = pl.BlockSpec((1, th, w, cp_out), lambda b, r: (b, r, 0, 0))
        semantics = ("parallel", "parallel")

    return pl.pallas_call(
        kernel,
        out_shape=out_shape,
        grid=grid,
        in_specs=in_specs,
        out_specs=out_specs,
        compiler_params=pltpu.CompilerParams(
            dimension_semantics=semantics,
            vmem_limit_bytes=VMEM_LIMIT_BYTES),
    )(x_halo, w_p, b_p)


def _prep_conv_params(w_oihw, b, cp_in, cp_out):
    """PyTorch (Cout, Cin, kh, kw) -> (kh, kw, Cin_p, Cout_p) bf16; bias -> (1, Cout_p) f32."""
    cout, cin = w_oihw.shape[0], w_oihw.shape[1]
    w = jnp.transpose(w_oihw, (2, 3, 1, 0))
    w = jnp.pad(w, ((0, 0), (0, 0), (0, cp_in - cin), (0, cp_out - cout)))
    b = jnp.pad(b, (0, cp_out - cout)).reshape(1, cp_out)
    return w.astype(jnp.bfloat16), b.astype(jnp.float32)


def image_encoder_forward(x_nchw, params, *, target_rows=512):
    """Equivalent of ImageEncoder.forward: backbone features + global avg pool -> (B, C_feat)."""
    w1, b1, w2, b2 = params
    cin, c1, c2 = w1.shape[1], w1.shape[0], w2.shape[0]
    cp0, cp1, cp2 = (_round_up(c, LANE) for c in (cin, c1, c2))

    x = jnp.transpose(x_nchw, (0, 2, 3, 1))                    # NCHW -> NHWC
    bsz, h, w, _ = x.shape
    th = _row_tile(h, w, target_rows)

    # one-time layout prep (cheap): 1-px spatial halo + channel pad to lane width, bf16
    x = jnp.pad(x, ((0, 0), (1, 1), (1, 1), (0, cp0 - cin))).astype(jnp.bfloat16)
    w1p, b1p = _prep_conv_params(w1, b1, cp0, cp1)
    w2p, b2p = _prep_conv_params(w2, b2, cp1, cp2)

    y1 = _conv_call(x, w1p, b1p, th, fuse_gap=False)           # (B, H, W, cp1) bf16
    y1 = jnp.pad(y1, ((0, 0), (1, 1), (1, 1), (0, 0)))         # halo only; channels stay padded
    feat = _conv_call(y1, w2p, b2p, th, fuse_gap=True)         # (B, 1, cp2) f32
    return feat[:, 0, :c2]                                     # slice channels only after GAP


# --------------------------------- reference ---------------------------------

def _reference_forward(x_nchw, params):
    """Pure-JAX f32 reference of the stand-in backbone (verification only)."""
    w1, b1, w2, b2 = params
    x = jnp.transpose(x_nchw, (0, 2, 3, 1))

    def conv_relu(x, w, b):
        k = jnp.transpose(w, (2, 3, 1, 0))                     # HWIO
        y = lax.conv_general_dilated(x, k, (1, 1), "SAME",
                                     dimension_numbers=("NHWC", "HWIO", "NHWC"))
        return jnp.maximum(y + b, 0.0)

    y = conv_relu(conv_relu(x, w1, b1), w2, b2)
    return jnp.mean(y, axis=(1, 2))


# ------------------------------------ main ------------------------------------

if __name__ == "__main__":
    key = jax.random.PRNGKey(0)
    k_x, k_w1, k_b1, k_w2, k_b2 = jax.random.split(key, 5)

    B, C, H, W = 2, 4, 16, 16          # small synthetic image batch (NCHW, PyTorch conv)
    C1, C2 = 32, 32                    # backbone channel widths / feature dim

    x_nchw = jax.random.normal(k_x, (B, C, H, W), jnp.float32)
    w1 = jax.random.normal(k_w1, (C1, C, 3, 3), jnp.float32) * 0.1
    b1 = jax.random.normal(k_b1, (C1,), jnp.float32) * 0.1
    w2 = jax.random.normal(k_w2, (C2, C1, 3, 3), jnp.float32) * 0.1
    b2 = jax.random.normal(k_b2, (C2,), jnp.float32) * 0.1

    # target_rows=128 at this toy spatial size -> 2 row blocks per image, so the
    # fused-GAP accumulator is exercised across multiple grid steps; real image sizes
    # would use the default 512+ row target.
    feats = image_encoder_forward(x_nchw, (w1, b1, w2, b2), target_rows=128)
    feats = jax.block_until_ready(feats)
    assert feats.shape == (B, C2), feats.shape
    assert bool(jnp.all(jnp.isfinite(feats)))

    ref = _reference_forward(x_nchw, (w1, b1, w2, b2))
    err = float(jnp.max(jnp.abs(feats - ref)))
    assert err < 5e-2, f"max abs error vs reference: {err}"

    print("KERNEL_OK")
</pallas_src>

<mosaic_0001>
module attributes {stable_mosaic.version = 11 : i64} {
  func.func @kernel(%arg0: i32, %arg1: i32, %arg2: memref<1x18x18x128xbf16, #tpu.memory_space<vmem>>, %arg3: memref<3x3x128x128xbf16, #tpu.memory_space<vmem>>, %arg4: memref<1x128xf32, #tpu.memory_space<vmem>>, %arg5: memref<1x8x16x128xbf16, #tpu.memory_space<vmem>>) attributes {dimension_semantics = [#tpu.dimension_semantics<parallel>, #tpu.dimension_semantics<parallel>], iteration_bounds = array<i64: 2, 2>, scalar_prefetch = 0 : i64, scratch_operands = 0 : i64, tpu.core_type = #tpu.core_type<tc>, window_params = [{transform_indices = @transform_0, window_bounds = array<i64: 1, 18, 18, 128>}, {pipeline_mode = #tpu.pipeline_mode<synchronous>, transform_indices = @transform_1, window_bounds = array<i64: 3, 3, 128, 128>}, {pipeline_mode = #tpu.pipeline_mode<synchronous>, transform_indices = @transform_2, window_bounds = array<i64: 1, 128>}, {transform_indices = @transform_3, window_bounds = array<i64: 1, 8, 16, 128>}]} {
    %c8_i32 = arith.constant 8 : i32
    %0 = arith.muli %arg1, %c8_i32 : i32
    %c0 = arith.constant 0 : index
    %1 = arith.index_cast %0 : i32 to index
    %c0_0 = arith.constant 0 : index
    %c0_1 = arith.constant 0 : index
    %2 = vector.load %arg2[%c0, %1, %c0_0, %c0_1] : memref<1x18x18x128xbf16, #tpu.memory_space<vmem>>, vector<1x10x18x128xbf16>
    %3 = vector.shape_cast %2 : vector<1x10x18x128xbf16> to vector<10x18x128xbf16>
    %cst = arith.constant 0.000000e+00 : f32
    %4 = vector.broadcast %cst : f32 to vector<128x128xf32>
    %5 = vector.extract_strided_slice %3 {offsets = [0, 0, 0], sizes = [8, 16, 128], strides = [1, 1, 1]} : vector<10x18x128xbf16> to vector<8x16x128xbf16>
    %6 = vector.shape_cast %5 : vector<8x16x128xbf16> to vector<128x128xbf16>
    %c0_2 = arith.constant 0 : index
    %c0_3 = arith.constant 0 : index
    %c0_4 = arith.constant 0 : index
    %c0_5 = arith.constant 0 : index
    %7 = vector.load %arg3[%c0_2, %c0_3, %c0_4, %c0_5] : memref<3x3x128x128xbf16, #tpu.memory_space<vmem>>, vector<1x1x128x128xbf16>
    %8 = vector.shape_cast %7 : vector<1x1x128x128xbf16> to vector<128x128xbf16>
    %cst_6 = arith.constant dense<0.000000e+00> : vector<128x128xf32>
    %9 = tpu.matmul %6, %8, %cst_6 {dimension_numbers = #tpu.dot_dimension_numbers<[1], [0], [0], [1], [0, 0, 1, 1], [], []>} : vector<128x128xbf16>, vector<128x128xbf16>, vector<128x128xf32> -> vector<128x128xf32>
    %10 = arith.addf %4, %9 : vector<128x128xf32>
    %11 = vector.extract_strided_slice %3 {offsets = [0, 1, 0], sizes = [8, 16, 128], strides = [1, 1, 1]} : vector<10x18x128xbf16> to vector<8x16x128xbf16>
    %12 = vector.shape_cast %11 : vector<8x16x128xbf16> to vector<128x128xbf16>
    %c0_7 = arith.constant 0 : index
    %c1 = arith.constant 1 : index
    %c0_8 = arith.constant 0 : index
    %c0_9 = arith.constant 0 : index
    %13 = vector.load %arg3[%c0_7, %c1, %c0_8, %c0_9] : memref<3x3x128x128xbf16, #tpu.memory_space<vmem>>, vector<1x1x128x128xbf16>
    %14 = vector.shape_cast %13 : vector<1x1x128x128xbf16> to vector<128x128xbf16>
    %cst_10 = arith.constant dense<0.000000e+00> : vector<128x128xf32>
    %15 = tpu.matmul %12, %14, %cst_10 {dimension_numbers = #tpu.dot_dimension_numbers<[1], [0], [0], [1], [0, 0, 1, 1], [], []>} : vector<128x128xbf16>, vector<128x128xbf16>, vector<128x128xf32> -> vector<128x128xf32>
    %16 = arith.addf %10, %15 : vector<128x128xf32>
    %17 = vector.extract_strided_slice %3 {offsets = [0, 2, 0], sizes = [8, 16, 128], strides = [1, 1, 1]} : vector<10x18x128xbf16> to vector<8x16x128xbf16>
    %18 = vector.shape_cast %17 : vector<8x16x128xbf16> to vector<128x128xbf16>
    %c0_11 = arith.constant 0 : index
    %c2 = arith.constant 2 : index
    %c0_12 = arith.constant 0 : index
    %c0_13 = arith.constant 0 : index
    %19 = vector.load %arg3[%c0_11, %c2, %c0_12, %c0_13] : memref<3x3x128x128xbf16, #tpu.memory_space<vmem>>, vector<1x1x128x128xbf16>
    %20 = vector.shape_cast %19 : vector<1x1x128x128xbf16> to vector<128x128xbf16>
    %cst_14 = arith.constant dense<0.000000e+00> : vector<128x128xf32>
    %21 = tpu.matmul %18, %20, %cst_14 {dimension_numbers = #tpu.dot_dimension_numbers<[1], [0], [0], [1], [0, 0, 1, 1], [], []>} : vector<128x128xbf16>, vector<128x128xbf16>, vector<128x128xf32> -> vector<128x128xf32>
    %22 = arith.addf %16, %21 : vector<128x128xf32>
    %23 = vector.extract_strided_slice %3 {offsets = [1, 0, 0], sizes = [8, 16, 128], strides = [1, 1, 1]} : vector<10x18x128xbf16> to vector<8x16x128xbf16>
    %24 = vector.shape_cast %23 : vector<8x16x128xbf16> to vector<128x128xbf16>
    %c1_15 = arith.constant 1 : index
    %c0_16 = arith.constant 0 : index
    %c0_17 = arith.constant 0 : index
    %c0_18 = arith.constant 0 : index
    %25 = vector.load %arg3[%c1_15, %c0_16, %c0_17, %c0_18] : memref<3x3x128x128xbf16, #tpu.memory_space<vmem>>, vector<1x1x128x128xbf16>
    %26 = vector.shape_cast %25 : vector<1x1x128x128xbf16> to vector<128x128xbf16>
    %cst_19 = arith.constant dense<0.000000e+00> : vector<128x128xf32>
    %27 = tpu.matmul %24, %26, %cst_19 {dimension_numbers = #tpu.dot_dimension_numbers<[1], [0], [0], [1], [0, 0, 1, 1], [], []>} : vector<128x128xbf16>, vector<128x128xbf16>, vector<128x128xf32> -> vector<128x128xf32>
    %28 = arith.addf %22, %27 : vector<128x128xf32>
    %29 = vector.extract_strided_slice %3 {offsets = [1, 1, 0], sizes = [8, 16, 128], strides = [1, 1, 1]} : vector<10x18x128xbf16> to vector<8x16x128xbf16>
    %30 = vector.shape_cast %29 : vector<8x16x128xbf16> to vector<128x128xbf16>
    %c1_20 = arith.constant 1 : index
    %c1_21 = arith.constant 1 : index
    %c0_22 = arith.constant 0 : index
    %c0_23 = arith.constant 0 : index
    %31 = vector.load %arg3[%c1_20, %c1_21, %c0_22, %c0_23] : memref<3x3x128x128xbf16, #tpu.memory_space<vmem>>, vector<1x1x128x128xbf16>
    %32 = vector.shape_cast %31 : vector<1x1x128x128xbf16> to vector<128x128xbf16>
    %cst_24 = arith.constant dense<0.000000e+00> : vector<128x128xf32>
    %33 = tpu.matmul %30, %32, %cst_24 {dimension_numbers = #tpu.dot_dimension_numbers<[1], [0], [0], [1], [0, 0, 1, 1], [], []>} : vector<128x128xbf16>, vector<128x128xbf16>, vector<128x128xf32> -> vector<128x128xf32>
    %34 = arith.addf %28, %33 : vector<128x128xf32>
    %35 = vector.extract_strided_slice %3 {offsets = [1, 2, 0], sizes = [8, 16, 128], strides = [1, 1, 1]} : vector<10x18x128xbf16> to vector<8x16x128xbf16>
    %36 = vector.shape_cast %35 : vector<8x16x128xbf16> to vector<128x128xbf16>
    %c1_25 = arith.constant 1 : index
    %c2_26 = arith.constant 2 : index
    %c0_27 = arith.constant 0 : index
    %c0_28 = arith.constant 0 : index
    %37 = vector.load %arg3[%c1_25, %c2_26, %c0_27, %c0_28] : memref<3x3x128x128xbf16, #tpu.memory_space<vmem>>, vector<1x1x128x128xbf16>
    %38 = vector.shape_cast %37 : vector<1x1x128x128xbf16> to vector<128x128xbf16>
    %cst_29 = arith.constant dense<0.000000e+00> : vector<128x128xf32>
    %39 = tpu.matmul %36, %38, %cst_29 {dimension_numbers = #tpu.dot_dimension_numbers<[1], [0], [0], [1], [0, 0, 1, 1], [], []>} : vector<128x128xbf16>, vector<128x128xbf16>, vector<128x128xf32> -> vector<128x128xf32>
    %40 = arith.addf %34, %39 : vector<128x128xf32>
    %41 = vector.extract_strided_slice %3 {offsets = [2, 0, 0], sizes = [8, 16, 128], strides = [1, 1, 1]} : vector<10x18x128xbf16> to vector<8x16x128xbf16>
    %42 = vector.shape_cast %41 : vector<8x16x128xbf16> to vector<128x128xbf16>
    %c2_30 = arith.constant 2 : index
    %c0_31 = arith.constant 0 : index
    %c0_32 = arith.constant 0 : index
    %c0_33 = arith.constant 0 : index
    %43 = vector.load %arg3[%c2_30, %c0_31, %c0_32, %c0_33] : memref<3x3x128x128xbf16, #tpu.memory_space<vmem>>, vector<1x1x128x128xbf16>
    %44 = vector.shape_cast %43 : vector<1x1x128x128xbf16> to vector<128x128xbf16>
    %cst_34 = arith.constant dense<0.000000e+00> : vector<128x128xf32>
    %45 = tpu.matmul %42, %44, %cst_34 {dimension_numbers = #tpu.dot_dimension_numbers<[1], [0], [0], [1], [0, 0, 1, 1], [], []>} : vector<128x128xbf16>, vector<128x128xbf16>, vector<128x128xf32> -> vector<128x128xf32>
    %46 = arith.addf %40, %45 : vector<128x128xf32>
    %47 = vector.extract_strided_slice %3 {offsets = [2, 1, 0], sizes = [8, 16, 128], strides = [1, 1, 1]} : vector<10x18x128xbf16> to vector<8x16x128xbf16>
    %48 = vector.shape_cast %47 : vector<8x16x128xbf16> to vector<128x128xbf16>
    %c2_35 = arith.constant 2 : index
    %c1_36 = arith.constant 1 : index
    %c0_37 = arith.constant 0 : index
    %c0_38 = arith.constant 0 : index
    %49 = vector.load %arg3[%c2_35, %c1_36, %c0_37, %c0_38] : memref<3x3x128x128xbf16, #tpu.memory_space<vmem>>, vector<1x1x128x128xbf16>
    %50 = vector.shape_cast %49 : vector<1x1x128x128xbf16> to vector<128x128xbf16>
    %cst_39 = arith.constant dense<0.000000e+00> : vector<128x128xf32>
    %51 = tpu.matmul %48, %50, %cst_39 {dimension_numbers = #tpu.dot_dimension_numbers<[1], [0], [0], [1], [0, 0, 1, 1], [], []>} : vector<128x128xbf16>, vector<128x128xbf16>, vector<128x128xf32> -> vector<128x128xf32>
    %52 = arith.addf %46, %51 : vector<128x128xf32>
    %53 = vector.extract_strided_slice %3 {offsets = [2, 2, 0], sizes = [8, 16, 128], strides = [1, 1, 1]} : vector<10x18x128xbf16> to vector<8x16x128xbf16>
    %54 = vector.shape_cast %53 : vector<8x16x128xbf16> to vector<128x128xbf16>
    %c2_40 = arith.constant 2 : index
    %c2_41 = arith.constant 2 : index
    %c0_42 = arith.constant 0 : index
    %c0_43 = arith.constant 0 : index
    %55 = vector.load %arg3[%c2_40, %c2_41, %c0_42, %c0_43] : memref<3x3x128x128xbf16, #tpu.memory_space<vmem>>, vector<1x1x128x128xbf16>
    %56 = vector.shape_cast %55 : vector<1x1x128x128xbf16> to vector<128x128xbf16>
    %cst_44 = arith.constant dense<0.000000e+00> : vector<128x128xf32>
    %57 = tpu.matmul %54, %56, %cst_44 {dimension_numbers = #tpu.dot_dimension_numbers<[1], [0], [0], [1], [0, 0, 1, 1], [], []>} : vector<128x128xbf16>, vector<128x128xbf16>, vector<128x128xf32> -> vector<128x128xf32>
    %58 = arith.addf %52, %57 : vector<128x128xf32>
    %c0_45 = arith.constant 0 : index
    %c0_46 = arith.constant 0 : index
    %59 = vector.load %arg4[%c0_45, %c0_46] : memref<1x128xf32, #tpu.memory_space<vmem>>, vector<1x128xf32>
    %60 = vector.broadcast %59 : vector<1x128xf32> to vector<128x128xf32>
    %61 = arith.addf %58, %60 : vector<128x128xf32>
    %cst_47 = arith.constant 0.000000e+00 : f32
    %62 = vector.broadcast %cst_47 : f32 to vector<128x128xf32>
    %63 = arith.maximumf %61, %62 : vector<128x128xf32>
    %64 = vector.shape_cast %63 : vector<128x128xf32> to vector<8x16x128xf32>
    %65 = arith.truncf %64 : vector<8x16x128xf32> to vector<8x16x128xbf16>
    %c0_48 = arith.constant 0 : index
    %c0_49 = arith.constant 0 : index
    %c0_50 = arith.constant 0 : index
    %c0_51 = arith.constant 0 : index
    %66 = vector.load %arg5[%c0_48, %c0_49, %c0_50, %c0_51] : memref<1x8x16x128xbf16, #tpu.memory_space<vmem>>, vector<1x8x16x128xbf16>
    %67 = vector.shape_cast %66 : vector<1x8x16x128xbf16> to vector<8x16x128xbf16>
    %68 = vector.shape_cast %65 : vector<8x16x128xbf16> to vector<1x8x16x128xbf16>
    tpu.vector_store %arg5[%c0_48, %c0_49, %c0_50, %c0_51], %68 {strides = array<i32>} : memref<1x8x16x128xbf16, #tpu.memory_space<vmem>>, vector<1x8x16x128xbf16>,
    return
  }
  func.func @transform_0(%arg0: i32, %arg1: i32) -> (i32, i32, i32, i32) {
    %c0_i32 = arith.constant 0 : i32
    %c0_i32_0 = arith.constant 0 : i32
    %c0_i32_1 = arith.constant 0 : i32
    %c0_i32_2 = arith.constant 0 : i32
    return %arg0, %c0_i32, %c0_i32_0, %c0_i32_1 : i32, i32, i32, i32
  }
  func.func @transform_1(%arg0: i32, %arg1: i32) -> (i32, i32, i32, i32) {
    %c0_i32 = arith.constant 0 : i32
    %c0_i32_0 = arith.constant 0 : i32
    %c0_i32_1 = arith.constant 0 : i32
    %c0_i32_2 = arith.constant 0 : i32
    %c0_i32_3 = arith.constant 0 : i32
    return %c0_i32, %c0_i32_0, %c0_i32_1, %c0_i32_2 : i32, i32, i32, i32
  }
  func.func @transform_2(%arg0: i32, %arg1: i32) -> (i32, i32) {
    %c0_i32 = arith.constant 0 : i32
    %c0_i32_0 = arith.constant 0 : i32
    %c0_i32_1 = arith.constant 0 : i32
    return %c0_i32, %c0_i32_0 : i32, i32
  }
  func.func @transform_3(%arg0: i32, %arg1: i32) -> (i32, i32, i32, i32) {
    %c0_i32 = arith.constant 0 : i32
    %c0_i32_0 = arith.constant 0 : i32
    %c0_i32_1 = arith.constant 0 : i32
    return %arg0, %arg1, %c0_i32, %c0_i32_0 : i32, i32, i32, i32
  }
}

</mosaic_0001>

<bundles_post_ra>
// kernel: tpu_custom_call.1
= control target key start
LH: loop header
LB: loop body
LE: loop exit
PB: predicated region body
PF: predicated region fallthrough
CT: control target
= control target key end

     0   :  { %8 = vsyncpa [#allocation3], 0  ;;  %s4451_s0 = inlined_call_operand.vmem [shape: bf16[2,18,18,128], index: 0, kind: input, shape index: {}]   ;;  %s4452_s1 = inlined_call_operand.vmem [shape: bf16[3,3,128,128], index: 1, kind: input, shape index: {}]   ;;  %s4453_s2 = inlined_call_operand.vmem [shape: f32[1,128], index: 2, kind: input, shape index: {}]   ;;  %s4454_s3 = inlined_call_operand.hbm [shape: bf16[2,16,16,128], index: 3, kind: output, shape index: {}]  }
   0x1   :  { %10 = vsyncpa [#allocation3 + $0x1], 0  ;;  %s3658_s12 = smov 0   ;;  %s3660_s13 = smov 0  }
   0x2   :  { %s3662_s14 = smov 0   ;;  %s3664_s15 = smov 0  }
   0x3   :  { %s3666_s16 = smov 0   ;;  %s3668_s17 = smov 0  }
   0x4   :  { %s3670_s18 = smov 0   ;;  %s3672_s19 = smov 0  }
   0x5 LB: > { %s2468_s20 = sadd.s32 4294967295, %s3633_s19   ;;  %s2469_s21 = sadd.s32 4294967294, %s3633_s19   ;;  %s3633_s19 = sphi %s3672_s19, %s16_s19   ;;  %s3629_s18 = sphi %s3670_s18, %s4467_s18   ;;  %s3625_s17 = sphi %s3668_s17, %s4466_s17   ;;  %s3621_s16 = sphi %s3666_s16, %s4465_s16   ;;  %s3617_s15 = sphi %s3664_s15, %s4464_s15   ;;  %s3613_s14 = sphi %s3662_s14, %s4463_s14   ;;  %s3609_s13 = sphi %s3660_s13, %s4462_s13   ;;  %s3605_s12 = sphi %s3658_s12, %s4461_s12  }
   0x6   : > { %s25_s22 = sadd.s32 1, %s3625_s17  ;;  %s28_s23 = sadd.s32 1, %s3629_s18 }
   0x7   : > { %p26_p0 = scmp.ge.s32.totalorder %s25_s22, 2  ;;  %p115_p1 = scmp.ne.s32.totalorder %s3613_s14, %s3609_s13 }
   0x8   : > { %p116_p2 = scmp.eq.s32.totalorder %s2468_s20, 3  ;;  %p121_p5 = scmp.ne.s32.totalorder %s3609_s13, %s3605_s12 }
   0x9   : > { %s4469_s22 = smov (%p26_p0, %s25_s22), 0  ;;  %s4471_s23 = smov (!%p26_p0, %s28_s23), %s3629_s18 }
   0xa   : > { %s101_s24 = ssub.s32 %s3625_s17, %s4469_s22  ;;  %p3709_p3 = por %p116_p2, %p115_p1 }
   0xb   : > { %p30_p4 = scmp.ge.s32.totalorder %s4471_s23, 2  ;;  %p122_p6 = scmp.eq.s32.totalorder %s2469_s21, 3 }
   0xc   : > { %p2472_p7 = scmp.ge.s32.totalorder %s3633_s19, 1  ;;  %p154_p9 = scmp.lt.s32.totalorder %s3633_s19, 5 }
   0xd   : > { %s4473_s23 = smov (%p30_p4, %s4471_s23), 0  ;;  %p3718_p8 = por %p122_p6, %p121_p5 }
   0xe   : > { %s100_s27 = ssub.s32 %s3629_s18, %s4473_s23  ;;  %s105_s28 = sadd.s32 1, %s3613_s14 }
   0xf   : > { %s102_s29 = sor.u32 %s101_s24, %s100_s27  ;;  %p155_p10 = pnand %p2472_p7, %p154_p9 }
  0x10   : > { %p103_p11 = scmp.eq.s32.totalorder %s102_s29, 0  ;;  %v3457_v0 = vld [vmem:[%s4452_s1 + $0x40] sm:$0xff] (!%p155_p10)   ;;  %p178_p12 = scmp.lt.s32.totalorder (!%p155_p10), %s3621_s16, 1  ;;  %v3459_v2 = vld [vmem:[%s4452_s1 + $0x48] sm:$0xff] (!%p155_p10)   ;;  %v3461_v4 = vld [vmem:[%s4452_s1 + $0x50] sm:$0xff] (!%p155_p10)   ;;  %vm825_vm3 = vcmask (!%p155_p10), 1042432  }
  0x11   : > { %158 = sbr.rel (%p155_p10) target bundleno = 428 (0x1ac), region = 32  ;;  %v3458_v1 = vld [vmem:[%s4452_s1 + $0x100] sm:$0xff] (!%p155_p10)   ;;  %2951 = vmatprep.subr.bf16.mxu1 (!%p155_p10), %v3457_v0  ;;  %v3460_v3 = vld [vmem:[%s4452_s1 + $0x108] sm:$0xff] (!%p155_p10)   ;;  %v3462_v5 = vld [vmem:[%s4452_s1 + $0x110] sm:$0xff] (!%p155_p10)   ;;  %vm235_vm0 = vsmask.f32 (!%p155_p10), 3328 }
  0x12   : > { %s3727_s30 = scalar_select %p103_p11, %s3613_s14, %s105_s28  }
  0x13   : > { %3079 = vmatprep.subr.bf16.mxu0 (!%p155_p10), %v3458_v1  ;;  %2952 = vmatpush3.bf16.msra.mxu1 (!%p155_p10), %v3457_v0  ;;  %v3463_v6 = vld [vmem:[%s4452_s1 + $0x58] sm:$0xff] (!%p155_p10)   ;;  %s2742_s8 = smul.u32 (!%p155_p10), 96, %s3617_s15  ;;  %v3465_v8 = vld [vmem:[%s4452_s1 + $0x60] sm:$0xff] (!%p155_p10)   ;;  %v3467_v10 = vld [vmem:[%s4452_s1 + $0x68] sm:$0xff] (!%p155_p10)   ;;  %vm236_vm1 = vsmask.f32 (!%p155_p10), 7440 }
  0x14   : > { %3080 = vmatpush3.bf16.msra.mxu0 (!%p155_p10), %v3458_v1  ;;  %2953 = vmatprep.subr.bf16.mxu1 (!%p155_p10), %v3459_v2  ;;  %v3464_v7 = vld [vmem:[%s4452_s1 + $0x118] sm:$0xff] (!%p155_p10)   ;;  %v3466_v9 = vld [vmem:[%s4452_s1 + $0x120] sm:$0xff] (!%p155_p10)   ;;  %v3468_v11 = vld [vmem:[%s4452_s1 + $0x128] sm:$0xff] (!%p155_p10)   ;;  %vm826_vm4 = vcmask (!%p155_p10), 1046532   ;;  %s2759_s24 = sshll.u32 (!%p155_p10), %s3617_s15, 4  ;;  %s2738_s27 = sshll.u32 (!%p155_p10), %s3621_s16, 5 }
  0x15   : > { %3081 = vmatprep.subr.bf16.mxu0 (!%p155_p10), %v3460_v3  ;;  %v3469_v17 = vld [vmem:[%s4452_s1 + $0x70] sm:$0xff] (!%p155_p10)   ;;  %v3471_v35 = vld [vmem:[%s4452_s1 + $0x78] sm:$0xff] (!%p155_p10)   ;;  %vm3811_vm2 = vmor (!%p155_p10), %vm235_vm0, %vm236_vm1  ;;  %s2387_s15 = sadd.s32 (!%p155_p10), %s2759_s24, %s2738_s27 }
  0x16   : > { %v3470_v30 = vld [vmem:[%s4452_s1 + $0x130] sm:$0xff] (!%p155_p10)   ;;  %v3472_v51 = vld [vmem:[%s4452_s1 + $0x138] sm:$0xff] (!%p155_p10)   ;;  %v3473_v0 = vld [vmem:[%s4452_s1] sm:$0xff] (!%p155_p10)  }
  0x17   : > { %2954 = vmatpush3.bf16.msra.mxu1 (!%p155_p10), %v3459_v2  ;;  %vm4012_vm5 = vmor (!%p155_p10), %vm825_vm3, %vm826_vm4 }
  0x18   : > { %s179_s10 = scalar_select %p178_p12, %s3621_s16, 1  ;;  %3082 = vmatpush3.bf16.msra.mxu0 %v3460_v3  ;;  %2955 = vmatprep.subr.bf16.mxu1 %v3461_v4 }
  0x19   : > { %3083 = vmatprep.subr.bf16.mxu0 %v3462_v5  ;;  %s2739_s16 = sshll.u32 %s2387_s15, 6 }
  0x1a   : > { %s3383_s29 = smul.u32 216, %s179_s10 }
  0x1b   : > { %2956 = vmatpush3.bf16.msra.mxu1 %v3461_v4  ;;  %v3474_v4 = vld [vmem:[%s4452_s1 + $0x140] sm:$0xff]  }
  0x1c   : > { %s182_s20 = scalar_lea.vmem %s4451_s0, %s3383_s29  ;;  %3084 = vmatpush3.bf16.msra.mxu0 %v3462_v5  ;;  %2957 = vmatprep.subr.bf16.mxu1 %v3463_v6 }
  0x1d   : > { %3085 = vmatprep.subr.bf16.mxu0 %v3464_v7  ;;  %s3765_s28 = scalar_lea.vmem %s182_s20, %s2742_s8  ;;  %s175_s20 = sand.u32 1, %s3609_s13  }
  0x1e   : > { %v3774_v12 = vld [vmem:[%s3765_s28] sm:$0xf]  ;;  %v3777_v13 = vld [vmem:[%s3765_s28 + $0x4] sm:$0xf]  ;;  %v3780_v14 = vld [vmem:[%s3765_s28 + $0x8] sm:$0x1] }
  0x1f   : > { %2958 = vmatpush3.bf16.msra.mxu1 %v3463_v6  ;;  %v239_v15 = vshrl.u32 %v3774_v12, 16  ;;  %v242_v16 = vshll.u32 %v3774_v12, 16  ;;  %v248_v18 = vshll.u32 %v3777_v13, 16  ;;  %v252_v19 = vshrl.u32 %v3777_v13, 16  ;;  %v3791_v21 = vld [vmem:[%s3765_s28 + $0xc] sm:$0xf] }
  0x20   : > { %3086 = vmatpush3.bf16.msra.mxu0 %v3464_v7  ;;  %2959 = vmatprep.subr.bf16.mxu1 %v3465_v8  ;;  %v258_v20 = vshll.u32 %v3780_v14, 16  ;;  %v3794_v24 = vld [vmem:[%s3765_s28 + $0x10] sm:$0xf]  ;;  %v3797_v25 = vld [vmem:[%s3765_s28 + $0x14] sm:$0x1]  ;;  %v263_v29 = vshrl.u32 %v3791_v21, 16 }
  0x21   : > { %3087 = vmatprep.subr.bf16.mxu0 %v3466_v9  ;;  %v241_v22 = vrot.slane %v239_v15, 4  ;;  %v244_v23 = vrot.slane %v242_v16, 5  ;;  %v250_v26 = vrot.slane %v248_v18, 5  ;;  %v254_v27 = vrot.slane %v252_v19, 4  ;;  %v3817_v40 = vld [vmem:[%s3765_s28 + $0x18] sm:$0xf] }
  0x22   : > { %v260_v28 = vrot.slane %v258_v20, 5  ;;  %v266_v32 = vshll.u32 %v3791_v21, 16  ;;  %v272_v33 = vshll.u32 %v3794_v24, 16  ;;  %v276_v34 = vshrl.u32 %v3794_v24, 16  ;;  %v3820_v41 = vld [vmem:[%s3765_s28 + $0x1c] sm:$0xf] }
  0x23   : > { %2960 = vmatpush3.bf16.msra.mxu1 %v3465_v8  ;;  %v245_v31 = vor.u32 %v244_v23, %v241_v22  ;;  %v255_v37 = vor.u32 %v254_v27, %v250_v26  ;;  %v265_v38 = vrot.slane %v263_v29, 4  ;;  %v282_v39 = vshll.u32 %v3797_v25, 16  ;;  %v3823_v46 = vld [vmem:[%s3765_s28 + $0x20] sm:$0x1]  ;;  %v3848_v7 = vld [vmem:[%s3765_s28 + $0x24] sm:$0xf] }
  0x24   : > { %3088 = vmatpush3.bf16.msra.mxu0 %v3466_v9  ;;  %2961 = vmatprep.subr.bf16.mxu1 %v3467_v10  ;;  %v268_v43 = vrot.slane %v266_v32, 5  ;;  %v274_v44 = vrot.slane %v272_v33, 5  ;;  %v278_v45 = vrot.slane %v276_v34, 4  ;;  %v287_v49 = vshrl.u32 %v3817_v40, 16  ;;  %v3851_v8 = vld [vmem:[%s3765_s28 + $0x28] sm:$0xf] }
  0x25   : > { %3089 = vmatprep.subr.bf16.mxu0 %v3468_v11  ;;  %v246_v42 = vrot.slane %v245_v31, 4  ;;  %v256_v47 = vrot.slane %v255_v37, 4  ;;  %v284_v48 = vrot.slane %v282_v39, 5  ;;  %v290_v50 = vshll.u32 %v3817_v40, 16  ;;  %v3854_v9 = vld [vmem:[%s3765_s28 + $0x2c] sm:$0x1] }
  0x26   : > { %v269_v53 = vor.u32 %v268_v43, %v265_v38  ;;  %v279_v54 = vor.u32 %v278_v45, %v274_v44  ;;  %v296_v55 = vshll.u32 %v3820_v41, 16  ;;  %v289_v57 = vrot.slane %v287_v49, 4  ;;  %v3864_v23 = vld [vmem:[%s3765_s28 + $0x30] sm:$0xf]  ;;  %v3870_v29 = vld [vmem:[%s3765_s28 + $0x34] sm:$0xf] }
  0x27   : > { %2962 = vmatpush3.bf16.msra.mxu1 %v3467_v10  ;;  %v251_v52 = vsel %vm3811_vm2, %v246_v42, %v250_v26  ;;  %v261_v56 = vsel %vm3811_vm2, %v256_v47, %v260_v28  ;;  %v292_v58 = vrot.slane %v290_v50, 5  ;;  %v300_v59 = vshrl.u32 %v3820_v41, 16  ;;  %v3476_v37 = vld [vmem:[%s4452_s1 + $0x148] sm:$0xff]   ;;  %v3477_v47 = vld [vmem:[%s4452_s1 + $0x10] sm:$0xff]   ;;  %s2473_s10 = sshll.u32 %s175_s20, 6  ;;  %s4399_s6 = scalar_lea.sflag [#allocation3], %s175_s20 }
  0x28   : > { %3090 = vmatpush3.bf16.msra.mxu0 %v3468_v11  ;;  %2963 = vmatprep.subr.bf16.mxu1 %v3469_v17  ;;  %v2494_v60 = vcombine.low %v251_v52, %v261_v56  ;;  %v270_v61 = vrot.slane %v269_v53, 4  ;;  %v280_v62 = vrot.slane %v279_v54, 4  ;;  %v298_v63 = vrot.slane %v296_v55, 5  ;;  %v3478_v56 = vld [vmem:[%s4452_s1 + $0x150] sm:$0xff]   ;;  %s4364_s21 = scalar_lea.vmem [#allocation2], %s2473_s10  ;;  %s3635_s8 = smov [#allocation2]  }
  0x29   : > { %3091 = vmatprep.subr.bf16.mxu0 %v3470_v30  ;;  %v293_v1 = vor.u32 %v292_v58, %v289_v57  ;;  %v302_v2 = vrot.slane %v300_v59, 4  ;;  %v306_v3 = vshll.u32 %v3823_v46, 16  ;;  %v311_v18 = vshrl.u32 %v3848_v7, 16  ;;  %s2390_s4 = sshll.u32 %s4364_s21, 4  ;;  %s3543_s9 = sshll.u32 %s3635_s8, 4  ;;  %s4393_s4 = int_to_ptr.vmem [resolvable:$true] %s2390_s4  ;;  %s3544_s9 = int_to_ptr.vmem [resolvable:$false] %s3543_s9 }
  0x2a   : > { %2967 = vmatprep.mubr.bf16.mxu1 %v2494_v60  ;;  %v275_v5 = vsel %vm3811_vm2, %v270_v61, %v274_v44  ;;  %v285_v6 = vsel %vm3811_vm2, %v280_v62, %v284_v48  ;;  %v314_v19 = vshll.u32 %v3848_v7, 16  ;;  %v320_v20 = vshll.u32 %v3851_v8, 16  ;;  %v3896_v60 = vld [vmem:[%s3765_s28 + $0x3c] sm:$0xf]  ;;  %v3899_v61 = vld [vmem:[%s3765_s28 + $0x40] sm:$0xf]  ;;  %p3546_p2 = scmp.lt.s32.totalorder %s4393_s4, %s3544_s9 }
  0x2b   : > { %2964 = vmatpush3.bf16.msra.mxu1 %v3469_v17  ;;  %v2495_v10 = vcombine.low %v275_v5, %v285_v6  ;;  %v294_v11 = vrot.slane %v293_v1, 4  ;;  %v303_v15 = vor.u32 %v302_v2, %v298_v63  ;;  %v308_v16 = vrot.slane %v306_v3, 5  ;;  %v3475_v17 = vld [vmem:[%s4452_s1 + $0x8] sm:$0xff]   ;;  %v3479_v6 = vld [vmem:[%s4452_s1 + $0x18] sm:$0xff]   ;;  %s3539_s7 = scalar_lea.vmem %s4393_s4, 1024  ;;  %s3545_s11 = scalar_lea.vmem %s3544_s9, 2048 }
  0x2c   : > { %3092 = vmatpush3.bf16.msra.mxu0 %v3470_v30  ;;  %2965 = vmatprep.subr.bf16.mxu1 %v3471_v35  ;;  %v324_v22 = vshrl.u32 %v3851_v8, 16  ;;  %v330_v28 = vshll.u32 %v3854_v9, 16  ;;  %v3873_v30 = vld [vmem:[%s3765_s28 + $0x38] sm:$0x1]  ;;  %v313_v31 = vrot.slane %v311_v18, 4  ;;  %v316_v32 = vrot.slane %v314_v19, 5  ;;  %p3540_p13 = scmp.ne.s32.totalorder %s4393_s4, %s3539_s7  ;;  %p3547_p4 = scmp.lt.s32.totalorder %s3545_s11, %s3539_s7 }
  0x2d   : > { %3093 = vmatprep.subr.bf16.mxu0 %v3472_v51  ;;  %3095 = vmatprep.mubr.bf16.mxu0 %v2495_v10  ;;  %v299_v26 = vsel %vm3811_vm2, %v294_v11, %v298_v63  ;;  %v304_v27 = vrot.slane %v303_v15, 4  ;;  %v322_v33 = vrot.slane %v320_v20, 5  ;;  %v335_v39 = vshrl.u32 %v3864_v23, 16  ;;  %v3919_v18 = vld [vmem:[%s3765_s28 + $0x48] sm:$0xf] }
  0x2e   : > { %v326_v34 = vrot.slane %v324_v22, 4  ;;  %v332_v38 = vrot.slane %v330_v28, 5  ;;  %v338_v42 = vshll.u32 %v3864_v23, 16  ;;  %v317_v44 = vor.u32 %v316_v32, %v313_v31  ;;  %v3480_v28 = vld [vmem:[%s4452_s1 + $0x158] sm:$0xff]   ;;  %p3541_p0 = pnand %p3540_p13, %p3709_p3  ;;  %p3548_p5 = por %p3547_p4, %p3546_p2 }
  0x2f   : > { %2966 = vmatpush3.bf16.msra.mxu1 %v3471_v35  ;;  %v309_v35 = vsel %vm3811_vm2, %v304_v27, %v308_v16  ;;  %v344_v48 = vshll.u32 %v3870_v29, 16  ;;  %v337_v49 = vrot.slane %v335_v39, 4  ;;  %v354_v52 = vshll.u32 %v3873_v30, 16  ;;  %v3928_v27 = vld [vmem:[%s3765_s28 + $0x50] sm:$0x1] }
  0x30   : > { %3094 = vmatpush3.bf16.msra.mxu0 %v3472_v51  ;;  %2983 = vmatprep.subr.bf16.mxu1 %v3473_v0  ;;  %v3882_v43 = vcombine.low %v299_v26, %v309_v35  ;;  %v327_v45 = vor.u32 %v326_v34, %v322_v33  ;;  %v340_v50 = vrot.slane %v338_v42, 5  ;;  %v348_v51 = vshrl.u32 %v3870_v29, 16  ;;  %v3925_v26 = vld [vmem:[%s3765_s28 + $0x4c] sm:$0xf]  ;;  %p3542_p1 = pneg %p3541_p0 }
  0x31   : > { %3111 = vmatprep.subr.bf16.mxu0 %v3474_v4  ;;  %v318_v53 = vrot.slane %v317_v44, 4  ;;  %v346_v55 = vrot.slane %v344_v48, 5  ;;  %v356_v59 = vrot.slane %v354_v52, 5  ;;  %v359_v1 = vshrl.u32 %v3896_v60, 16 }
  0x32   : > { %2968 = vmatmul.mubr.bf16.vlgmr.msra.gmra.mrb[0].mxu1 %v2495_v10  ;;  %v328_v54 = vrot.slane %v327_v45, 4  ;;  %v341_v57 = vor.u32 %v340_v50, %v337_v49  ;;  %v350_v58 = vrot.slane %v348_v51, 4  ;;  %v362_v2 = vshll.u32 %v3896_v60, 16  ;;  %p3549_p6 = pnand %p3548_p5, %p3542_p1 }
  0x33   : > { %2984 = vmatpush3.bf16.msra.mxu1 %v3473_v0  ;;  %3096 = vmatmul.mubr.bf16.vlgmr.msra.gmra.mrb[0].mxu0 %v3882_v43  ;;  %v323_v62 = vsel %vm3811_vm2, %v318_v53, %v322_v33  ;;  %v3906_v0 = vld [vmem:[%s3765_s28 + $0x44] sm:$0x1]  ;;  %v368_v10 = vshll.u32 %v3899_v61, 16  ;;  %v361_v11 = vrot.slane %v359_v1, 4  ;;  %v372_v16 = vshrl.u32 %v3899_v61, 16 }
  0x34   : > { %2985 = vmatprep.subr.bf16.mxu1 %v3475_v17  ;;  %2971 = vmatprep.mubr.bf16.mxu1 %v3882_v43  ;;  %v333_v63 = vsel %vm3811_vm2, %v328_v54, %v332_v38  ;;  %v351_v5 = vor.u32 %v350_v58, %v346_v55  ;;  %v364_v15 = vrot.slane %v362_v2, 5  ;;  %v383_v34 = vshrl.u32 %v3919_v18, 16 }
  0x35   : > { %3112 = vmatpush3.bf16.msra.mxu0 %v3474_v4  ;;  %v3910_v3 = vcombine.low %v323_v62, %v333_v63  ;;  %v342_v4 = vrot.slane %v341_v57, 4  ;;  %v370_v22 = vrot.slane %v368_v10, 5  ;;  %v374_v32 = vrot.slane %v372_v16, 4  ;;  %v3953_v57 = vld [vmem:[%s3765_s28 + $0x54] sm:$0xf] }
  0x36   : > { %3113 = vmatprep.subr.bf16.mxu0 %v3476_v37  ;;  %v352_v20 = vrot.slane %v351_v5, 4  ;;  %v365_v31 = vor.u32 %v364_v15, %v361_v11  ;;  %v386_v38 = vshll.u32 %v3919_v18, 16  ;;  %v392_v39 = vshll.u32 %v3925_v26, 16  ;;  %v3957_v62 = vld [vmem:[%s3765_s28 + $0x58] sm:$0xf] }
  0x37   : > { %2986 = vmatpush3.bf16.msra.mxu1 %v3475_v17  ;;  %v378_v17 = vshll.u32 %v3906_v0, 16  ;;  %3099 = vmatprep.mubr.bf16.mxu0 %v3910_v3  ;;  %v347_v19 = vsel %vm3811_vm2, %v342_v4, %v346_v55  ;;  %v396_v42 = vshrl.u32 %v3925_v26, 16  ;;  %v375_v48 = vor.u32 %v374_v32, %v370_v22  ;;  %v3482_v55 = vld [vmem:[%s4452_s1 + $0x160] sm:$0xff]   ;;  %v3960_v63 = vld [vmem:[%s3765_s28 + $0x5c] sm:$0x1]  ;;  %v3483_v4 = vld [vmem:[%s4452_s1 + $0x28] sm:$0xff]  }
  0x38   : > { %2987 = vmatprep.subr.bf16.mxu1 %v3477_v47  ;;  %v357_v35 = vsel %vm3811_vm2, %v352_v20, %v356_v59  ;;  %v366_v45 = vrot.slane %v365_v31, 4  ;;  %v385_v49 = vrot.slane %v383_v34, 4  ;;  %v394_v50 = vrot.slane %v392_v39, 5  ;;  %v3993_v39 = vld [vmem:[%s3765_s28 + $0x68] sm:$0x1] }
  0x39   : > { %3114 = vmatpush3.bf16.msra.mxu0 %v3476_v37  ;;  %v380_v33 = vrot.slane %v378_v17, 5  ;;  %v3481_v37 = vld [vmem:[%s4452_s1 + $0x20] sm:$0xff]   ;;  %v3943_v44 = vcombine.low %v347_v19, %v357_v35  ;;  %v398_v51 = vrot.slane %v396_v42, 4  ;;  %v402_v52 = vshll.u32 %v3928_v27, 16  ;;  %v3484_v17 = vld [vmem:[%s4452_s1 + $0x168] sm:$0xff]   ;;  %v3485_v35 = vld [vmem:[%s4452_s1 + $0x30] sm:$0xff]  }
  0x3a   : > { %2972 = vmatmul.mubr.bf16.gmra.mrb[4].mxu1 %v3910_v3  ;;  %3115 = vmatprep.subr.bf16.mxu0 %v3478_v56  ;;  %v371_v53 = vsel %vm3811_vm2, %v366_v45, %v370_v22  ;;  %v376_v54 = vrot.slane %v375_v48, 4  ;;  %v407_v1 = vshrl.u32 %v3953_v57, 16  ;;  %v410_v5 = vshll.u32 %v3953_v57, 16 }
  0x3b   : > { %2988 = vmatpush3.bf16.msra.mxu1 %v3477_v47  ;;  %v388_v47 = vrot.slane %v386_v38, 5  ;;  %3100 = vmatmul.mubr.bf16.gmra.mrb[4].mxu0 %v3943_v44  ;;  %v399_v58 = vor.u32 %v398_v51, %v394_v50  ;;  %v404_v59 = vrot.slane %v402_v52, 5  ;;  %v420_v10 = vshrl.u32 %v3957_v62, 16  ;;  %v3990_v38 = vld [vmem:[%s3765_s28 + $0x64] sm:$0xf]  ;;  %v3486_v51 = vld [vmem:[%s4452_s1 + $0x170] sm:$0xff]  }
  0x3c   : > { %2989 = vmatprep.subr.bf16.mxu1 %v3479_v6  ;;  %2975 = vmatprep.mubr.bf16.mxu1 %v3943_v44  ;;  %v381_v2 = vsel %vm3811_vm2, %v376_v54, %v380_v33  ;;  %v409_v19 = vrot.slane %v407_v1, 4  ;;  %v412_v20 = vrot.slane %v410_v5, 5  ;;  %v426_v32 = vshll.u32 %v3960_v63, 16  ;;  %v3978_v33 = vld [vmem:[%s3765_s28 + $0x60] sm:$0xf] }
  0x3d   : > { %3116 = vmatpush3.bf16.msra.mxu0 %v3478_v56  ;;  %v389_v56 = vor.u32 %v388_v47, %v385_v49  ;;  %v3971_v11 = vcombine.low %v371_v53, %v381_v2  ;;  %v400_v16 = vrot.slane %v399_v58, 4  ;;  %v422_v31 = vrot.slane %v420_v10, 4 }
  0x3e   : > { %3117 = vmatprep.subr.bf16.mxu0 %v3480_v28  ;;  %v1279_v42 = vshrl.u32 %v3978_v33, 16  ;;  %v1282_v45 = vshll.u32 %v3978_v33, 16  ;;  %v413_v49 = vor.u32 %v412_v20, %v409_v19  ;;  %v1288_v54 = vshll.u32 %v3990_v38, 16 }
  0x3f   : > { %2990 = vmatpush3.bf16.msra.mxu1 %v3479_v6  ;;  %v416_v6 = vshll.u32 %v3957_v62, 16  ;;  %v390_v15 = vrot.slane %v389_v56, 4  ;;  %3103 = vmatprep.mubr.bf16.mxu0 %v3971_v11  ;;  %v405_v34 = vsel %vm3811_vm2, %v400_v16, %v404_v59  ;;  %v1292_v56 = vshrl.u32 %v3990_v38, 16 }
  0x40   : > { %2991 = vmatprep.subr.bf16.mxu1 %v3481_v37  ;;  %v1281_v52 = vrot.slane %v1279_v42, 4  ;;  %v1284_v53 = vrot.slane %v1282_v45, 5  ;;  %v414_v58 = vrot.slane %v413_v49, 4  ;;  %v1298_v59 = vshll.u32 %v3993_v39, 16 }
  0x41   : > { %3118 = vmatpush3.bf16.msra.mxu0 %v3480_v28  ;;  %v418_v22 = vrot.slane %v416_v6, 5  ;;  %v395_v28 = vsel %vm3811_vm2, %v390_v15, %v394_v50  ;;  %v428_v50 = vrot.slane %v426_v32, 5  ;;  %v2527_v1 = vrot.slane %v3791_v21, 9 }
  0x42   : > { %3119 = vmatprep.subr.bf16.mxu0 %v3482_v55  ;;  %2976 = vmatmul.mubr.bf16.gmra.mrb[8].mxu1 %v3971_v11  ;;  %v3997_v48 = vcombine.low %v395_v28, %v405_v34  ;;  %v1285_v2 = vor.u32 %v1284_v53, %v1281_v52  ;;  %v1294_v5 = vrot.slane %v1292_v56, 4  ;;  %v2510_v6 = vcombine.low %v3774_v12, %v3777_v13  ;;  %v3487_v34 = vld [vmem:[%s4452_s1 + $0x38] sm:$0xff]  }
  0x43   : > { %2992 = vmatpush3.bf16.msra.mxu1 %v3481_v37  ;;  %v423_v47 = vor.u32 %v422_v31, %v418_v22  ;;  %v419_v15 = vsel %vm3811_vm2, %v414_v58, %v418_v22  ;;  %v1300_v19 = vrot.slane %v1298_v59, 5  ;;  %v837_v20 = vrot.slane %v3794_v24, 5  ;;  %v3488_v22 = vld [vmem:[%s4452_s1 + $0x178] sm:$0xff]  }
  0x44   : > { %2993 = vmatprep.subr.bf16.mxu1 %v3483_v4  ;;  %3104 = vmatmul.mubr.bf16.gmra.mrb[8].mxu0 %v3997_v48  ;;  %v1286_v32 = vrot.slane %v1285_v2, 4  ;;  %v844_v45 = vrot.slane %v3820_v41, 5  ;;  %v2528_v53 = vrot.slane %v3817_v40, 9  ;;  %v4062_v2 = vcombine.low %v3791_v21, %v3794_v24  ;;  %v3493_v21 = vld [vmem:[%s4452_s1 + $0x88] sm:$0xff]  }
  0x45   : > { %3120 = vmatpush3.bf16.msra.mxu0 %v3482_v55  ;;  %v424_v37 = vrot.slane %v423_v47, 4  ;;  %2979 = vmatprep.mubr.bf16.mxu1 %v3997_v48  ;;  %v1290_v55 = vrot.slane %v1288_v54, 5  ;;  %v838_v42 = vsel %vm4012_vm5, %v2527_v1, %v837_v20  ;;  %v2529_v1 = vrot.slane %v3848_v7, 9 }
  0x46   : > { %3121 = vmatprep.subr.bf16.mxu0 %v3484_v17  ;;  %v846_v58 = vrot.slane %v844_v45, 4  ;;  %v858_v24 = vrot.slane %v3870_v29, 5 }
  0x47   : > { %2994 = vmatpush3.bf16.msra.mxu1 %v3483_v4  ;;  %v429_v16 = vsel %vm3811_vm2, %v424_v37, %v428_v50  ;;  %v1295_v28 = vor.u32 %v1294_v5, %v1290_v55  ;;  %v840_v4 = vrot.slane %v3797_v25, 5  ;;  %v1291_v49 = vsel %vm3811_vm2, %v1286_v32, %v1290_v55 }
  0x48   : > { %v4021_v31 = vcombine.low %v419_v15, %v429_v16  ;;  %2995 = vmatprep.subr.bf16.mxu1 %v3485_v35  ;;  %v4039_v25 = vcombine.low %v3978_v33, %v3990_v38  ;;  %v847_v50 = vrot.slane %v3823_v46, 5  ;;  %v851_v37 = vrot.slane %v3851_v8, 5  ;;  %v3491_v46 = vld [vmem:[%s4452_s1 + $0x80] sm:$0xff]  }
  0x49   : > { %3122 = vmatpush3.bf16.msra.mxu0 %v3484_v17  ;;  %v839_v17 = vrot.slane %v837_v20, 4  ;;  %v1296_v47 = vrot.slane %v1295_v28, 4  ;;  %v4067_v5 = vcombine.low %v3817_v40, %v3820_v41  ;;  %v865_v15 = vrot.slane %v3899_v61, 5 }
  0x4a   : > { %3123 = vmatprep.subr.bf16.mxu0 %v3486_v51  ;;  %3107 = vmatprep.mubr.bf16.mxu0 %v4021_v31  ;;  %v853_v55 = vrot.slane %v851_v37, 4  ;;  %v852_v40 = vsel %vm4012_vm5, %v2529_v1, %v851_v37  ;;  %v2530_v20 = vrot.slane %v3864_v23, 9  ;;  %v860_v28 = vrot.slane %v858_v24, 4  ;;  %v3500_v37 = vld [vmem:[%s4452_s1 + $0x198] sm:$0xff]  }
  0x4b   : > { %2980 = vmatmul.mubr.bf16.gmra.mrb[12].mxu1 %v4021_v31  ;;  %v841_v52 = vsel %vm4012_vm5, %v839_v17, %v840_v4  ;;  %v1301_v54 = vsel %vm3811_vm2, %v1296_v47, %v1300_v19  ;;  %v3494_v19 = vld [vmem:[%s4452_s1 + $0x188] sm:$0xff]   ;;  %v3497_v4 = vld [vmem:[%s4452_s1 + $0x90] sm:$0xff]   ;;  %v868_v17 = vrot.slane %v3906_v0, 5  ;;  %v872_v47 = vrot.slane %v3925_v26, 5  ;;  %v3499_v0 = vld [vmem:[%s4452_s1 + $0x98] sm:$0xff]  }
  0x4c   : > { %2996 = vmatpush3.bf16.msra.mxu1 %v3485_v35  ;;  %2999 = vmatprep.mubr.bf16.mxu1 %v2510_v6  ;;  %v4047_v56 = vcombine.low %v838_v42, %v841_v52  ;;  %v4050_v59 = vcombine.low %v1291_v49, %v1301_v54  ;;  %v3492_v35 = vld [vmem:[%s4452_s1 + $0x180] sm:$0xff]   ;;  %v845_v6 = vsel %vm4012_vm5, %v2528_v53, %v844_v45  ;;  %v867_v42 = vrot.slane %v865_v15, 4 }
  0x4d   : > { %3124 = vmatpush3.bf16.msra.mxu0 %v3486_v51  ;;  %2997 = vmatprep.subr.bf16.mxu1 %v3487_v34  ;;  %v854_v51 = vrot.slane %v3854_v9, 5  ;;  %v848_v9 = vsel %vm4012_vm5, %v846_v58, %v847_v50  ;;  %v4101_v45 = vcombine.low %v3848_v7, %v3851_v8  ;;  %v4109_v49 = vcombine.low %v3864_v23, %v3870_v29 }
  0x4e   : > { %3125 = vmatprep.subr.bf16.mxu0 %v3488_v22  ;;  %3108 = vmatmul.mubr.bf16.gmra.mrb[12].mxu0 %v4050_v59  ;;  %v4084_v16 = vcombine.low %v845_v6, %v848_v9  ;;  %v833_v50 = vrot.slane %v3780_v14, 5  ;;  %v859_v7 = vsel %vm4012_vm5, %v2530_v20, %v858_v24  ;;  %v869_v14 = vsel %vm4012_vm5, %v867_v42, %v868_v17  ;;  %v3511_v17 = vld [vmem:[%s4452_s1 + $0xb8] sm:$0xff]  }
  0x4f   : > { %3127 = vmatprep.mubr.bf16.mxu0 %v4047_v56  ;;  %v855_v41 = vsel %vm4012_vm5, %v853_v55, %v854_v51  ;;  %v879_v29 = vrot.slane %v3957_v62, 5  ;;  %v2526_v52 = vrot.slane %v3774_v12, 9  ;;  %v2532_v53 = vrot.slane %v3919_v18, 9 }
  0x50   : > { %2998 = vmatpush3.bf16.msra.mxu1 %v3487_v34  ;;  %v4091_v32 = vcombine.low %v852_v40, %v855_v41  ;;  %v861_v34 = vrot.slane %v3873_v30, 5  ;;  %v3498_v30 = vld [vmem:[%s4452_s1 + $0x190] sm:$0xff]   ;;  %v830_v54 = vrot.slane %v3777_v13, 5  ;;  %v874_v12 = vrot.slane %v872_v47, 4 }
  0x51   : > { %3126 = vmatpush3.bf16.msra.mxu0 %v3488_v22  ;;  %3015 = vmatprep.subr.bf16.mxu1 %v3491_v46  ;;  %v2531_v22 = vrot.slane %v3896_v60, 9  ;;  %v2533_v13 = vrot.slane %v3953_v57, 9  ;;  %v881_v6 = vrot.slane %v879_v29, 4  ;;  %v882_v9 = vrot.slane %v3960_v63, 5 }
  0x52   : > { %3143 = vmatprep.subr.bf16.mxu0 %v3492_v35  ;;  %v862_v8 = vsel %vm4012_vm5, %v860_v28, %v861_v34  ;;  %v831_v51 = vsel %vm4012_vm5, %v2526_v52, %v830_v54  ;;  %v832_v55 = vrot.slane %v830_v54, 4  ;;  %v4155_v24 = vcombine.low %v3919_v18, %v3925_v26  ;;  %v3504_v18 = vld [vmem:[%s4452_s1 + $0x1a0] sm:$0xff]   ;;  %v3523_v52 = vld [vmem:[%s4452_s1 + $0xe8] sm:$0xff]  }
  0x53   : > { %3000 = vmatmul.mubr.bf16.vlgmr.msra.gmra.mrb[0].mxu1 %v4062_v2  ;;  %v866_v23 = vsel %vm4012_vm5, %v2531_v22, %v865_v15  ;;  %v4130_v58 = vcombine.low %v859_v7, %v862_v8  ;;  %v873_v63 = vsel %vm4012_vm5, %v2532_v53, %v872_v47  ;;  %v1487_v41 = vrot.slane %v3990_v38, 5  ;;  %v3506_v38 = vld [vmem:[%s4452_s1 + $0x1a8] sm:$0xff]   ;;  %v3509_v22 = vld [vmem:[%s4452_s1 + $0xb0] sm:$0xff]   ;;  %v3513_v47 = vld [vmem:[%s4452_s1 + $0xc0] sm:$0xff]  }
  0x54   : > { %3016 = vmatpush3.bf16.msra.mxu1 %v3491_v46  ;;  %3003 = vmatprep.mubr.bf16.mxu1 %v4067_v5  ;;  %v3503_v46 = vld [vmem:[%s4452_s1 + $0xa0] sm:$0xff]   ;;  %v4140_v1 = vcombine.low %v866_v23, %v869_v14  ;;  %v880_v26 = vsel %vm4012_vm5, %v2533_v13, %v879_v29  ;;  %v883_v15 = vsel %vm4012_vm5, %v881_v6, %v882_v9  ;;  %v2616_v20 = vrot.slane %v3978_v33, 9  ;;  %v3516_v8 = vld [vmem:[%s4452_s1 + $0x1c8] sm:$0xff]   ;;  %v3518_v23 = vld [vmem:[%s4452_s1 + $0x1d0] sm:$0xff]  }
  0x55   : > { %3017 = vmatprep.subr.bf16.mxu1 %v3493_v21  ;;  %v4181_v28 = vcombine.low %v880_v26, %v883_v15  ;;  %v1489_v34 = vrot.slane %v1487_v41, 4  ;;  %v4189_v42 = vcombine.low %v3953_v57, %v3957_v62  ;;  %v3510_v57 = vld [vmem:[%s4452_s1 + $0x1b0] sm:$0xff]   ;;  %v3514_v7 = vld [vmem:[%s4452_s1 + $0x1c0] sm:$0xff]   ;;  %v3520_v14 = vld [vmem:[%s4452_s1 + $0x1d8] sm:$0xff]  }
  0x56   : > { %3128 = vmatmul.mubr.bf16.vlgmr.msra.gmra.mrb[0].mxu0 %v4084_v16  ;;  %v1488_v33 = vsel %vm4012_vm5, %v2616_v20, %v1487_v41  ;;  %v3521_v29 = vld [vmem:[%s4452_s1 + $0xe0] sm:$0xff]   ;;  %v3524_v54 = vld [vmem:[%s4452_s1 + $0x1e8] sm:$0xff]   ;;  %v3528_v13 = vld [vmem:[%s4452_s1 + $0x1f0] sm:$0xff]  }
  0x57   : > { %3144 = vmatpush3.bf16.msra.mxu0 %v3492_v35  ;;  %3131 = vmatprep.mubr.bf16.mxu0 %v4091_v32  ;;  %v875_v35 = vrot.slane %v3928_v27, 5  ;;  %v834_v27 = vsel %vm4012_vm5, %v832_v55, %v833_v50  ;;  %v3515_v50 = vld [vmem:[%s4452_s1 + $0xc8] sm:$0xff]   ;;  %v3522_v53 = vld [vmem:[%s4452_s1 + $0x1e0] sm:$0xff]   ;;  %v3530_v55 = vld [vmem:[%s4452_s1 + $0x1f8] sm:$0xff]  }
  0x58   : > { %3018 = vmatpush3.bf16.msra.mxu1 %v3493_v21  ;;  %3145 = vmatprep.subr.bf16.mxu0 %v3494_v19  ;;  %v4148_v21 = vcombine.low %v3896_v60, %v3899_v61  ;;  %v2550_v40 = vcombine.low %v831_v51, %v834_v27  ;;  %v3505_v61 = vld [vmem:[%s4452_s1 + $0xa8] sm:$0xff]   ;;  %v3531_v6 = vld [vmem:[%s4452_s1 + $0x200] sm:$0xff]   ;;  %v3533_v9 = vld [vmem:[%s4452_s1 + $0x210] sm:$0xff]  }
  0x59   : > { %3019 = vmatprep.subr.bf16.mxu1 %v3497_v4  ;;  %v876_v60 = vsel %vm4012_vm5, %v874_v12, %v875_v35  ;;  %v4266_v12 = vld [vmem:[%s3765_s28 + $0x70] sm:$0xf]  ;;  %v3529_v35 = vld [vmem:[%s4452_s1 + $0xf8] sm:$0xff]   ;;  %v218_v41 = vld [vmem:[%s3765_s28 + $0x74] sm:$0x1] }
  0x5a   : > { %v1878_v26 = vshll.u32 %v218_v41, 16 }
  0x5b   : > { %3004 = vmatmul.mubr.bf16.gmra.mrb[4].mxu1 %v4101_v45  ;;  %3146 = vmatpush3.bf16.msra.mxu0 %v3494_v19  ;;  %v4174_v19 = vcombine.low %v873_v63, %v876_v60 }
  0x5c   : > { %3020 = vmatpush3.bf16.msra.mxu1 %v3497_v4  ;;  %3007 = vmatprep.mubr.bf16.mxu1 %v4109_v49  ;;  %v1490_v4 = vrot.slane %v3993_v39, 5 }
  0x5d   : > { %3021 = vmatprep.subr.bf16.mxu1 %v3499_v0  ;;  %3147 = vmatprep.subr.bf16.mxu0 %v3498_v30 }
  0x5e   : > { %3132 = vmatmul.mubr.bf16.gmra.mrb[4].mxu0 %v4130_v58  ;;  %v1491_v39 = vsel %vm4012_vm5, %v1489_v34, %v1490_v4  ;;  %v3538_v34 = vld [vmem:[%s4452_s1 + $0x238] sm:$0xff]  }
  0x5f   : > { %3148 = vmatpush3.bf16.msra.mxu0 %v3498_v30  ;;  %3135 = vmatprep.mubr.bf16.mxu0 %v4140_v1  ;;  %v4204_v62 = vcombine.low %v1488_v33, %v1491_v39  ;;  %v3512_v30 = vld [vmem:[%s4452_s1 + $0x1b8] sm:$0xff]  }
  0x60   : > { %3022 = vmatpush3.bf16.msra.mxu1 %v3499_v0  ;;  %3149 = vmatprep.subr.bf16.mxu0 %v3500_v37  ;;  %v3517_v0 = vld [vmem:[%s4452_s1 + $0xd0] sm:$0xff]  }
  0x61   : > { %3023 = vmatprep.subr.bf16.mxu1 %v3503_v46 }
  0x63   : > { %3008 = vmatmul.mubr.bf16.gmra.mrb[8].mxu1 %v4148_v21  ;;  %3150 = vmatpush3.bf16.msra.mxu0 %v3500_v37  ;;  %v3526_v37 = vld [vmem:[%s4452_s1 + $0xf0] sm:$0xff]  }
  0x64   : > { %3024 = vmatpush3.bf16.msra.mxu1 %v3503_v46  ;;  %3011 = vmatprep.mubr.bf16.mxu1 %v4155_v24  ;;  %v4263_v46 = vld [vmem:[%s3765_s28 + $0x6c] sm:$0xf]  ;;  %s4391_s28 = scalar_lea.hbm %s4454_s3, %s2739_s16 }
  0x65   : > { %3025 = vmatprep.subr.bf16.mxu1 %v3505_v61  ;;  %3151 = vmatprep.subr.bf16.mxu0 %v3504_v18  ;;  %v2658_v51 = vcombine.low %v4263_v46, %v4266_v12  ;;  %v1862_v27 = vshll.u32 %v4263_v46, 16  ;;  %v2692_v36 = vrot.slane %v4263_v46, 9 }
  0x66   : > { %3136 = vmatmul.mubr.bf16.gmra.mrb[8].mxu0 %v4174_v19 }
  0x67   : > { %3152 = vmatpush3.bf16.msra.mxu0 %v3504_v18  ;;  %3139 = vmatprep.mubr.bf16.mxu0 %v4181_v28  ;;  %v1864_v63 = vrot.slane %v1862_v27, 5 }
  0x68   : > { %3026 = vmatpush3.bf16.msra.mxu1 %v3505_v61  ;;  %3153 = vmatprep.subr.bf16.mxu0 %v3506_v38  ;;  %v3535_v61 = vld [vmem:[%s4452_s1 + $0x220] sm:$0xff]  }
  0x69   : > { %3027 = vmatprep.subr.bf16.mxu1 %v3509_v22 }
  0x6b   : > { %3012 = vmatmul.mubr.bf16.gmra.mrb[12].mxu1 %v4189_v42  ;;  %3154 = vmatpush3.bf16.msra.mxu0 %v3506_v38  ;;  %v1880_v38 = vrot.slane %v1878_v26, 5 }
  0x6c   : > { %3028 = vmatpush3.bf16.msra.mxu1 %v3509_v22  ;;  %3031 = vmatprep.mubr.bf16.mxu1 %v2550_v40  ;;  %v1872_v40 = vshrl.u32 %v4266_v12, 16  ;;  %v2070_v22 = vrot.slane %v218_v41, 5 }
  0x6d   : > { %3029 = vmatprep.subr.bf16.mxu1 %v3511_v17  ;;  %3155 = vmatprep.subr.bf16.mxu0 %v3510_v57 }
  0x6e   : > { %3140 = vmatmul.mubr.bf16.gmra.mrb[12].mxu0 %v4204_v62 }
  0x6f   : > { %3156 = vmatpush3.bf16.msra.mxu0 %v3510_v57  ;;  %3159 = vmatprep.mubr.bf16.mxu0 %v4067_v5 }
  0x70   : > { %3030 = vmatpush3.bf16.msra.mxu1 %v3511_v17  ;;  %3157 = vmatprep.subr.bf16.mxu0 %v3512_v30 }
  0x71   : > { %3047 = vmatprep.subr.bf16.mxu1 %v3513_v47 }
  0x73   : > { %3032 = vmatmul.mubr.bf16.vlgmr.msra.gmra.mrb[0].mxu1 %v4047_v56  ;;  %3158 = vmatpush3.bf16.msra.mxu0 %v3512_v30  ;;  %v3519_v56 = vld [vmem:[%s4452_s1 + $0xd8] sm:$0xff]  }
  0x74   : > { %3048 = vmatpush3.bf16.msra.mxu1 %v3513_v47  ;;  %3035 = vmatprep.mubr.bf16.mxu1 %v4084_v16 }
  0x75   : > { %3049 = vmatprep.subr.bf16.mxu1 %v3515_v50  ;;  %3175 = vmatprep.subr.bf16.mxu0 %v3514_v7 }
  0x76   : > { %3160 = vmatmul.mubr.bf16.vlgmr.msra.gmra.mrb[0].mxu0 %v4101_v45 }
  0x77   : > { %3176 = vmatpush3.bf16.msra.mxu0 %v3514_v7  ;;  %3163 = vmatprep.mubr.bf16.mxu0 %v4109_v49 }
  0x78   : > { %3050 = vmatpush3.bf16.msra.mxu1 %v3515_v50  ;;  %3177 = vmatprep.subr.bf16.mxu0 %v3516_v8 }
  0x79   : > { %3051 = vmatprep.subr.bf16.mxu1 %v3517_v0 }
  0x7b   : > { %3036 = vmatmul.mubr.bf16.gmra.mrb[4].mxu1 %v4091_v32  ;;  %3178 = vmatpush3.bf16.msra.mxu0 %v3516_v8 }
  0x7c   : > { %3052 = vmatpush3.bf16.msra.mxu1 %v3517_v0  ;;  %3039 = vmatprep.mubr.bf16.mxu1 %v4130_v58 }
  0x7d   : > { %3053 = vmatprep.subr.bf16.mxu1 %v3519_v56  ;;  %3179 = vmatprep.subr.bf16.mxu0 %v3518_v23 }
  0x7e   : > { %3164 = vmatmul.mubr.bf16.gmra.mrb[4].mxu0 %v4148_v21 }
  0x7f   : > { %3180 = vmatpush3.bf16.msra.mxu0 %v3518_v23  ;;  %3167 = vmatprep.mubr.bf16.mxu0 %v4155_v24 }
  0x80   : > { %3054 = vmatpush3.bf16.msra.mxu1 %v3519_v56  ;;  %3181 = vmatprep.subr.bf16.mxu0 %v3520_v14 }
  0x81   : > { %3055 = vmatprep.subr.bf16.mxu1 %v3521_v29 }
  0x83   : > { %3040 = vmatmul.mubr.bf16.gmra.mrb[8].mxu1 %v4140_v1  ;;  %3182 = vmatpush3.bf16.msra.mxu0 %v3520_v14 }
  0x84   : > { %3056 = vmatpush3.bf16.msra.mxu1 %v3521_v29  ;;  %3043 = vmatprep.mubr.bf16.mxu1 %v4174_v19 }
  0x85   : > { %3057 = vmatprep.subr.bf16.mxu1 %v3523_v52  ;;  %3183 = vmatprep.subr.bf16.mxu0 %v3522_v53 }
  0x86   : > { %3168 = vmatmul.mubr.bf16.gmra.mrb[8].mxu0 %v4189_v42 }
  0x87   : > { %3184 = vmatpush3.bf16.msra.mxu0 %v3522_v53  ;;  %3171 = vmatprep.mubr.bf16.mxu0 %v4039_v25 }
  0x88   : > { %3058 = vmatpush3.bf16.msra.mxu1 %v3523_v52  ;;  %3185 = vmatprep.subr.bf16.mxu0 %v3524_v54 }
  0x89   : > { %3059 = vmatprep.subr.bf16.mxu1 %v3526_v37 }
  0x8b   : > { %3044 = vmatmul.mubr.bf16.gmra.mrb[12].mxu1 %v4181_v28  ;;  %3186 = vmatpush3.bf16.msra.mxu0 %v3524_v54 }
  0x8c   : > { %3060 = vmatpush3.bf16.msra.mxu1 %v3526_v37  ;;  %3063 = vmatprep.mubr.bf16.mxu1 %v4062_v2  ;;  %v3532_v2 = vld [vmem:[%s4452_s1 + $0x208] sm:$0xff]  }
  0x8d   : > { %3061 = vmatprep.subr.bf16.mxu1 %v3529_v35  ;;  %3187 = vmatprep.subr.bf16.mxu0 %v3528_v13 }
  0x8e   : > { %3172 = vmatmul.mubr.bf16.gmra.mrb[12].mxu0 %v2658_v51 }
  0x8f   : > { %3188 = vmatpush3.bf16.msra.mxu0 %v3528_v13  ;;  %3191 = vmatprep.mubr.bf16.mxu0 %v3882_v43  ;;  %v1859_v43 = vshrl.u32 %v4263_v46, 16 }
  0x90   : > { %3062 = vmatpush3.bf16.msra.mxu1 %v3529_v35  ;;  %3189 = vmatprep.subr.bf16.mxu0 %v3530_v55 }
  0x91   : > { %3239 = vmatprep.subr.bf16.mxu1 %v3531_v6 }
  0x93   : > { %3064 = vmatmul.mubr.bf16.vlgmr.msra.gmra.mrb[0].mxu1 %v4067_v5  ;;  %3190 = vmatpush3.bf16.msra.mxu0 %v3530_v55  ;;  %v3534_v5 = vld [vmem:[%s4452_s1 + $0x218] sm:$0xff]  }
  0x94   : > { %3247 = vmatpush3.bf16.msra.mxu1 %v3531_v6  ;;  %3067 = vmatprep.mubr.bf16.mxu1 %v4101_v45  ;;  %v1868_v45 = vshll.u32 %v4266_v12, 16 }
  0x95   : > { %3240 = vmatprep.subr.bf16.mxu1 %v3532_v2  ;;  %3207 = vmatprep.subr.bf16.mxu0 %v3531_v6 }
  0x96   : > { %3192 = vmatmul.mubr.bf16.vlgmr.msra.gmra.mrb[0].mxu0 %v3910_v3  ;;  %v1861_v3 = vrot.slane %v1859_v43, 4  ;;  %v1870_v60 = vrot.slane %v1868_v45, 5 }
  0x97   : > { %3208 = vmatpush3.bf16.msra.mxu0 %v3531_v6  ;;  %3195 = vmatprep.mubr.bf16.mxu0 %v3943_v44  ;;  %v1874_v44 = vrot.slane %v1872_v40, 4  ;;  %v4352_v6 = vld [vmem:[%s4453_s2] ss:$0 sm:$0xff] }
  0x98   : > { %3248 = vmatpush3.bf16.msra.mxu1 %v3532_v2  ;;  %3209 = vmatprep.subr.bf16.mxu0 %v3532_v2 }
  0x99   : > { %3241 = vmatprep.subr.bf16.mxu1 %v3533_v9  ;;  %v1875_v18 = vor.u32 %v1874_v44, %v1870_v60 }
  0x9b   : > { %3068 = vmatmul.mubr.bf16.gmra.mrb[4].mxu1 %v4109_v49  ;;  %3210 = vmatpush3.bf16.msra.mxu0 %v3532_v2  ;;  %v3536_v49 = vld [vmem:[%s4452_s1 + $0x228] sm:$0xff]   ;;  %v1876_v15 = vrot.slane %v1875_v18, 4 }
  0x9c   : > { %3249 = vmatpush3.bf16.msra.mxu1 %v3533_v9  ;;  %3071 = vmatprep.mubr.bf16.mxu1 %v4148_v21  ;;  %v1865_v21 = vor.u32 %v1864_v63, %v1861_v3 }
  0x9d   : > { %3242 = vmatprep.subr.bf16.mxu1 %v3534_v5  ;;  %3211 = vmatprep.subr.bf16.mxu0 %v3533_v9  ;;  %v1881_v20 = vsel %vm3811_vm2, %v1876_v15, %v1880_v38 }
  0x9e   : > { %3196 = vmatmul.mubr.bf16.gmra.mrb[4].mxu0 %v3971_v11  ;;  %v1866_v11 = vrot.slane %v1865_v21, 4 }
  0x9f   : > { %3212 = vmatpush3.bf16.msra.mxu0 %v3533_v9  ;;  %3199 = vmatprep.mubr.bf16.mxu0 %v3997_v48  ;;  %v3537_v48 = vld [vmem:[%s4452_s1 + $0x230] sm:$0xff]  }
  0xa0   : > { %3250 = vmatpush3.bf16.msra.mxu1 %v3534_v5  ;;  %3213 = vmatprep.subr.bf16.mxu0 %v3534_v5 }
  0xa1   : > { %3243 = vmatprep.subr.bf16.mxu1 %v3535_v61 }
  0xa3   : > { %3072 = vmatmul.mubr.bf16.gmra.mrb[8].mxu1 %v4155_v24  ;;  %3214 = vmatpush3.bf16.msra.mxu0 %v3534_v5  ;;  %v1871_v24 = vsel %vm3811_vm2, %v1866_v11, %v1870_v60 }
  0xa4   : > { %3251 = vmatpush3.bf16.msra.mxu1 %v3535_v61  ;;  %3075 = vmatprep.mubr.bf16.mxu1 %v4189_v42  ;;  %v2683_v4 = vcombine.low %v1871_v24, %v1881_v20 }
  0xa5   : > { %3244 = vmatprep.subr.bf16.mxu1 %v3536_v49  ;;  %3215 = vmatprep.subr.bf16.mxu0 %v3535_v61 }
  0xa6   : > { %3200 = vmatmul.mubr.bf16.gmra.mrb[8].mxu0 %v4021_v31  ;;  %v2067_v31 = vrot.slane %v4266_v12, 5 }
  0xa7   : > { %3216 = vmatpush3.bf16.msra.mxu0 %v3535_v61  ;;  %3203 = vmatprep.mubr.bf16.mxu0 %v4050_v59 }
  0xa8   : > { %3252 = vmatpush3.bf16.msra.mxu1 %v3536_v49  ;;  %3217 = vmatprep.subr.bf16.mxu0 %v3536_v49  ;;  %v2069_v59 = vrot.slane %v2067_v31, 4 }
  0xa9   : > { %3245 = vmatprep.subr.bf16.mxu1 %v3537_v48 }
  0xab   : > { %3076 = vmatmul.mubr.bf16.gmra.mrb[12].mxu1 %v4039_v25  ;;  %3218 = vmatpush3.bf16.msra.mxu0 %v3536_v49  ;;  %v2068_v25 = vsel %vm4012_vm5, %v2692_v36, %v2067_v31 }
  0xac   : > { %3253 = vmatpush3.bf16.msra.mxu1 %v3537_v48  ;;  %3231 = vmatprep.mubr.bf16.mxu1 %v4174_v19  ;;  %v2071_v19 = vsel %vm4012_vm5, %v2069_v59, %v2070_v22 }
  0xad   : > { %3246 = vmatprep.subr.bf16.mxu1 %v3538_v34  ;;  %3219 = vmatprep.subr.bf16.mxu0 %v3537_v48  ;;  %v2709_v42 = vcombine.low %v2068_v25, %v2071_v19 }
  0xae   : > { %3204 = vmatmul.mubr.bf16.gmra.mrb[12].mxu0 %v2683_v4 }
  0xaf   : > { %3220 = vmatpush3.bf16.msra.mxu0 %v3537_v48  ;;  %3223 = vmatprep.mubr.bf16.mxu0 %v4084_v16 }
  0xb0   : > { %3254 = vmatpush3.bf16.msra.mxu1 %v3538_v34  ;;  %3221 = vmatprep.subr.bf16.mxu0 %v3538_v34 }
  0xb3   : > { %3232 = vmatmul.mubr.bf16.vlgmr.msra.gmra.mrb[16].mxu1 %v4181_v28  ;;  %3222 = vmatpush3.bf16.msra.mxu0 %v3538_v34 }
  0xb4   : > { %3235 = vmatprep.mubr.bf16.mxu1 %v4204_v62 }
  0xb6   : > { %3224 = vmatmul.mubr.bf16.vlgmr.msra.gmra.mrb[0].mxu0 %v4091_v32 }
  0xb7   : > { %3227 = vmatprep.mubr.bf16.mxu0 %v4130_v58 }
  0xbb   : > { %3236 = vmatmul.mubr.bf16.gmra.mrb[20].mxu1 %v2709_v42 }
  0xbe   : > { %3228 = vmatmul.mubr.bf16.gmra.mrb[4].mxu0 %v4140_v1 }
 0x166   : > { %v3065_v16 = vpop.f32.mrb[0].mxu1 }
 0x167   : > { %v1199_v33 = vpop.f32.mrb[1].mxu1 }
 0x168   : > { %v3066_v28 = vpop.f32.mrb[2].mxu1 }
 0x169   : > { %v1202_v39 = vpop.f32.mrb[3].mxu1 }
 0x16e   : > { %v4341_v17 = vpop.f32.mrb[4].mxu1 }
 0x16f   : > { %v4343_v57 = vpop.f32.mrb[5].mxu1 }
 0x170   : > { %v4345_v62 = vpop.f32.mrb[6].mxu1 }
 0x171   : > { %v4347_v10 = vpop.f32.mrb[7].mxu1 }
 0x176   : > { %v3073_v30 = vpop.f32.mrb[8].mxu1 }
 0x177   : > { %v1231_v47 = vpop.f32.mrb[9].mxu1 }
 0x178   : > { %v3074_v32 = vpop.f32.mrb[10].mxu1 }
 0x179   : > { %v1234_v50 = vpop.f32.mrb[11].mxu1  ;;  %v3201_v58 = vpop.f32.mrb[8].mxu0 }
 0x17a   : > { %v3263_v7 = vadd.f32 %v3201_v58, %v3073_v30  ;;  %v2017_v8 = vpop.f32.mrb[9].mxu0 }
 0x17b   : > { %v3265_v1 = vadd.f32 %v2017_v8, %v1231_v47  ;;  %v3202_v0 = vpop.f32.mrb[10].mxu0 }
 0x17c   : > { %v3267_v56 = vadd.f32 %v3202_v0, %v3074_v32  ;;  %v2020_v23 = vpop.f32.mrb[11].mxu0 }
 0x17d   : > { %v3269_v29 = vadd.f32 %v2020_v23, %v1234_v50 }
 0x17e   : > { %v3077_v14 = vpop.f32.mrb[12].mxu1 }
 0x17f   : > { %v1247_v52 = vpop.f32.mrb[13].mxu1 }
 0x180   : > { %v3078_v53 = vpop.f32.mrb[14].mxu1 }
 0x181   : > { %v1250_v54 = vpop.f32.mrb[15].mxu1  ;;  %v3205_v37 = vpop.f32.mrb[12].mxu0 }
 0x182   : > { %v3271_v46 = vadd.f32 %v3205_v37, %v3077_v14  ;;  %v2033_v12 = vpop.f32.mrb[13].mxu0 }
 0x183   : > { %v3273_v35 = vadd.f32 %v2033_v12, %v1247_v52  ;;  %v3206_v13 = vpop.f32.mrb[14].mxu0 }
 0x184   : > { %v3275_v51 = vadd.f32 %v3206_v13, %v3078_v53  ;;  %v2036_v55 = vpop.f32.mrb[15].mxu0 }
 0x185   : > { %v3277_v9 = vadd.f32 %v2036_v55, %v1250_v54 }
 0x186   : > { %v3233_v2 = vpop.f32.mrb[16].mxu1 }
 0x187   : > { %v3264_v43 = vadd.f32 %v3263_v7, %v3233_v2  ;;  %v2207_v27 = vpop.f32.mrb[17].mxu1 }
 0x188   : > { %v3266_v40 = vadd.f32 %v3265_v1, %v2207_v27  ;;  %v3234_v5 = vpop.f32.mrb[18].mxu1 }
 0x189   : > { %v2271_v45 = vadd.f32 %v3264_v43, %v4352_v6  ;;  %v3268_v3 = vadd.f32 %v3267_v56, %v3234_v5  ;;  %v2210_v63 = vpop.f32.mrb[19].mxu1  ;;  %v3225_v61 = vpop.f32.mrb[0].mxu0 }
 0x18a   : > { %v2269_v60 = vadd.f32 %v3266_v40, %v4352_v6  ;;  %v3270_v44 = vadd.f32 %v3269_v29, %v2210_v63  ;;  %v3255_v49 = vadd.f32 %v3225_v61, %v3065_v16  ;;  %v2175_v21 = vpop.f32.mrb[1].mxu0 }
 0x18b   : > { %v2272_v41 = vadd.f32 %v3268_v3, %v4352_v6  ;;  %v2287_v26 = vmax.f32 %v2271_v45, 0.0  ;;  %v3256_v11 = vadd.f32 %v2175_v21, %v1199_v33  ;;  %v3226_v15 = vpop.f32.mrb[2].mxu0 }
 0x18c   : > { %v2270_v18 = vadd.f32 %v3270_v44, %v4352_v6  ;;  %v2263_v48 = vadd.f32 %v3255_v49, %v4352_v6  ;;  %v2285_v24 = vmax.f32 %v2269_v60, 0.0  ;;  %v3257_v20 = vadd.f32 %v3226_v15, %v3066_v28  ;;  %v2178_v34 = vpop.f32.mrb[3].mxu0 }
 0x18d   : > { %v2288_v38 = vmax.f32 %v2272_v41, 0.0  ;;  %v2261_v36 = vadd.f32 %v3256_v11, %v4352_v6  ;;  %v3258_v22 = vadd.f32 %v2178_v34, %v1202_v39 }
 0x18e   : > { %v2286_v4 = vmax.f32 %v2270_v18, 0.0  ;;  %v3237_v31 = vpop.f32.mrb[20].mxu1  ;;  %v2264_v42 = vadd.f32 %v3257_v20, %v4352_v6  ;;  %v2279_v50 = vmax.f32 %v2263_v48, 0.0 }
 0x18f   : > { %v2788_v59 = vpack.c.bf16 %v2288_v38, %v2287_v26  ;;  %v3272_v25 = vadd.f32 %v3271_v46, %v3237_v31  ;;  %v2223_v19 = vpop.f32.mrb[21].mxu1  ;;  %v2262_v28 = vadd.f32 %v3258_v22, %v4352_v6  ;;  %v2277_v1 = vmax.f32 %v2261_v36, 0.0 }
 0x190   : > { %v2783_v16 = vpack.c.bf16 %v2286_v4, %v2285_v24  ;;  %v3274_v30 = vadd.f32 %v3273_v35, %v2223_v19  ;;  %v3238_v33 = vpop.f32.mrb[22].mxu1  ;;  %v2280_v58 = vmax.f32 %v2264_v42, 0.0 }
 0x191   : > { %2804 = vst [vmem:[%s4364_s21 + $0x28] sm:$0xff] %v2788_v59   ;;  %v2275_v47 = vadd.f32 %v3272_v25, %v4352_v6  ;;  %v3276_v32 = vadd.f32 %v3275_v51, %v3238_v33  ;;  %v2226_v39 = vpop.f32.mrb[23].mxu1  ;;  %v2278_v0 = vmax.f32 %v2262_v28, 0.0  ;;  %v3229_v56 = vpop.f32.mrb[4].mxu0 }
 0x192   : > { %2803 = vst [vmem:[%s4364_s21 + $0x20] sm:$0xff] %v2783_v16   ;;  %v2273_v7 = vadd.f32 %v3274_v30, %v4352_v6  ;;  %v3278_v8 = vadd.f32 %v3277_v9, %v2226_v39  ;;  %v2768_v14 = vpack.c.bf16 %v2280_v58, %v2279_v50  ;;  %v3259_v29 = vadd.f32 %v3229_v56, %v4341_v17  ;;  %v2191_v52 = vpop.f32.mrb[5].mxu0 }
 0x193   : > { %v2276_v23 = vadd.f32 %v3276_v32, %v4352_v6  ;;  %v2763_v54 = vpack.c.bf16 %v2278_v0, %v2277_v1  ;;  %v2291_v37 = vmax.f32 %v2275_v47, 0.0  ;;  %v3260_v46 = vadd.f32 %v2191_v52, %v4343_v57  ;;  %v3230_v12 = vpop.f32.mrb[6].mxu0 }
 0x194   : > { %v2274_v53 = vadd.f32 %v3278_v8, %v4352_v6  ;;  %2800 = vst [vmem:[%s4364_s21 + $0x8] sm:$0xff] %v2768_v14   ;;  %v2267_v13 = vadd.f32 %v3259_v29, %v4352_v6  ;;  %v2289_v51 = vmax.f32 %v2273_v7, 0.0  ;;  %v3261_v55 = vadd.f32 %v3230_v12, %v4345_v62  ;;  %v2194_v2 = vpop.f32.mrb[7].mxu0 }
 0x195   : > { %v2292_v35 = vmax.f32 %v2276_v23, 0.0  ;;  %2764 = vst [vmem:[%s4364_s21] sm:$0xff] %v2763_v54   ;;  %v2265_v9 = vadd.f32 %v3260_v46, %v4352_v6  ;;  %v3262_v57 = vadd.f32 %v2194_v2, %v4347_v10 }
 0x196   : > { %v2290_v17 = vmax.f32 %v2274_v53, 0.0  ;;  %v2268_v27 = vadd.f32 %v3261_v55, %v4352_v6  ;;  %v2283_v62 = vmax.f32 %v2267_v13, 0.0 }
 0x197   : > { %v2798_v43 = vpack.c.bf16 %v2292_v35, %v2291_v37  ;;  %v2266_v5 = vadd.f32 %v3262_v57, %v4352_v6  ;;  %v2281_v3 = vmax.f32 %v2265_v9, 0.0 }
 0x198   : > { %v2793_v40 = vpack.c.bf16 %v2290_v17, %v2289_v51  ;;  %v2284_v45 = vmax.f32 %v2268_v27, 0.0 }
 0x199   : > { %2806 = vst [vmem:[%s4364_s21 + $0x38] sm:$0xff] %v2798_v43   ;;  %v2282_v63 = vmax.f32 %v2266_v5, 0.0 }
 0x19a   : > { %2805 = vst [vmem:[%s4364_s21 + $0x30] sm:$0xff] %v2793_v40   ;;  %v2778_v60 = vpack.c.bf16 %v2284_v45, %v2283_v62 }
 0x19b   : > { %v2773_v10 = vpack.c.bf16 %v2282_v63, %v2281_v3 }
 0x19c   : > { %2802 = vst [vmem:[%s4364_s21 + $0x18] sm:$0xff] %v2778_v60  }
 0x19d   : > { %2801 = vst [vmem:[%s4364_s21 + $0x10] sm:$0xff] %v2773_v10  }
 0x19e   : > { %3552 = shalt.err (!%p3549_p6)
}
 0x19f   : > { %s3553_s20 = scalar_lea.hbm %s4391_s28, 1024  ;;  %s3557_s24 = scalar_lea.hbm %s4454_s3, 4096 }
 0x1a0   : > { %p3554_p7 = scmp.ne.s32.totalorder %s4391_s28, %s3553_s20  ;;  %p3558_p11 = scmp.lt.u32.totalorder %s4391_s28, %s4454_s3 }
 0x1a1   : > { %p3559_p12 = scmp.lt.u32.totalorder %s3557_s24, %s3553_s20  ;;  %p3561_p0 = scmp.lt.u32.totalorder %s3553_s20, %s4391_s28 }
 0x1a2   : > { %p3555_p9 = pnand %p3554_p7, %p3709_p3 }
 0x1a3   : > { %p3560_p13 = por %p3559_p12, %p3558_p11 }
 0x1a4   : > { %p3556_p10 = pneg %p3555_p9 }
 0x1a5   : > { %p3562_p1 = por %p3561_p0, %p3560_p13 }
 0x1a7   : > { %p3563_p2 = pnand %p3562_p1, %p3556_p10 }
 0x1a9   : > { %3566 = shalt.err (!%p3563_p2)
}
 0x1aa   : > { %s3636_s16 = smov 64   ;;  %s3637_s5 = smov 4  }
 0x1ab   : > { %3384 = dma.vmem_to_hbm [thread:$0]  (%p3709_p3), %s4393_s4, 1024, %s4391_s28, %s4399_s6, %s3636_s16, %s3636_s16, %s3637_s5  }
 0x1ac PF: > { %p3390_p4 = scmp.ge.s32.totalorder %s3633_s19, 2  ;;  %s2405_s29 = sand.u32 1, %s3605_s12  }
 0x1ad   : > { %s2406_s7 = scalar_lea.sflag [#allocation3], %s2405_s29 }
 0x1ae   : > { %p3387_p5 = pnand %p3390_p4, %p3718_p8 }
 0x1b0   : > { %3600 = dma.done.wait (!%p3387_p5), %s2406_s7, 1024  }
 0x1b1   : > { %3602 = vsyncadd (!%p3387_p5), %s2406_s7, 4294966272  ;;  %s16_s19 = sadd.s32 1, %s3633_s19   ;;  %s4461_s12 = smov %s3609_s13 }
 0x1b2   : > { %p13_p6 = scmp.ge.s32.totalorder %s16_s19, 6   ;;  %s4462_s13 = smov %s3613_s14 }
 0x1b3   : > { %s4463_s14 = smov %s3727_s30  ;;  %s4464_s15 = smov %s3625_s17 }
 0x1b4   : > { %s4465_s16 = smov %s3629_s18  ;;  %s4466_s17 = smov %s4469_s22 }
 0x1b5   : > { %s4467_s18 = smov %s4473_s23  ;;  %15 = sbr.rel (!%p13_p6) target bundleno = 5 (0x5), region = 76 }
 0x1bc   :  { %2411 = vsyncpa [#allocation3], 1 }
 0x1bd   :  { %2413 = vsyncpa [#allocation3 + $0x1], 1 }

</bundles_post_ra>
